<compile_context>
chip_gen: v7x
topology: tpu7x:2x2x1
jax: 0.10.0
libtpu: 0.0.40
codegen_flags: <defaults>
</compile_context>

<pallas_src>
import functools

import jax
import jax.numpy as jnp
from jax import lax
from jax.experimental import pallas as pl
from jax.experimental.pallas import tpu as pltpu


def conv_block_kernel(x_ref, w_ref, b_ref, col_ref, o_ref, patches_ref, *, H, W):
    """One batch element per grid step.

    x_ref:       (1, Cin, H*W)   channels x flattened spatial (lane-dense)
    w_ref:       (Cout, 9*Cin)   3x3 taps flattened tap-major on the K axis
    b_ref:       (Cout, 1)
    col_ref:     (1, H*W) int32  x-coordinate of each flattened pixel (const)
    o_ref:       (1, Cout, H*W)
    patches_ref: (9*Cin, H*W)    VMEM scratch: shifted images (im2col rows)
    """
    HW = H * W
    Cin = x_ref.shape[1]

    # Zero the assembly buffer: pixels whose 3x3 source falls outside the image
    # keep 0 -> implements the conv's zero padding without padding in HBM.
    patches_ref[...] = jnp.zeros_like(patches_ref)

    xf = x_ref[0]          # (Cin, HW)
    col = col_ref[...]     # (1, HW)

    # For output pixel p = y*W + x and tap offset (oy, ox), the source pixel is
    # flat index p + oy*W + ox.  Place each shifted image with static slices;
    # sources that wrap across a row boundary are masked via the column index.
    for dy in range(3):
        for dx in range(3):
            t = dy * 3 + dx
            oy, ox = dy - 1, dx - 1
            k = oy * W + ox                  # flat source offset
            lo = max(0, -k)                  # first output pixel with in-range source
            hi = HW - max(0, k)              # one past the last such pixel
            piece = xf[:, lo + k:hi + k]     # (Cin, hi - lo)
            if ox == -1:                     # left neighbor: invalid where x == 0
                piece = jnp.where(col[:, lo:hi] >= 1, piece, 0.0)
            elif ox == 1:                    # right neighbor: invalid where x == W-1
                piece = jnp.where(col[:, lo:hi] <= W - 2, piece, 0.0)
            patches_ref[t * Cin:(t + 1) * Cin, lo:hi] = piece

    # Single fused K = 9*Cin matmul on the MXU, f32 accumulation.
    acc = jnp.dot(w_ref[...], patches_ref[...],
                  preferred_element_type=jnp.float32)
    acc = acc + b_ref[...]                   # (Cout, HW) + (Cout, 1) broadcast
    acc = jnp.maximum(acc, 0.2 * acc)        # LeakyReLU(0.2)
    o_ref[0] = acc.astype(o_ref.dtype)


def conv_block_forward(x_nchw, weight, bias):
    """x_nchw: (N, Cin, H, W); weight: (Cout, Cin, 3, 3); bias: (Cout,)."""
    N, Cin, H, W = x_nchw.shape
    Cout = weight.shape[0]
    HW = H * W

    # Free, contiguous reshapes only — no transpose / pad HBM round trips.
    x_flat = x_nchw.reshape(N, Cin, HW)
    # (Cout, Cin, 3, 3) -> (Cout, 3, 3, Cin) -> (Cout, 9*Cin): tap-major rows,
    # matching the tap order used to assemble patches in the kernel.
    w2 = jnp.transpose(weight, (0, 2, 3, 1)).reshape(Cout, 9 * Cin)
    b2 = bias.reshape(Cout, 1)
    # Tiny static constant (1 x HW int32) used for border masking in-kernel.
    col_ids = (jnp.arange(HW, dtype=jnp.int32) % W).reshape(1, HW)

    flops = 2 * N * HW * 9 * Cin * Cout
    bytes_accessed = 4 * (x_flat.size + w2.size + b2.size + col_ids.size
                          + N * Cout * HW)

    kernel = functools.partial(conv_block_kernel, H=H, W=W)

    out_flat = pl.pallas_call(
        kernel,
        out_shape=jax.ShapeDtypeStruct((N, Cout, HW), x_nchw.dtype),
        grid_spec=pltpu.PrefetchScalarGridSpec(
            num_scalar_prefetch=0,
            grid=(N,),
            in_specs=[
                pl.BlockSpec((1, Cin, HW), lambda n: (n, 0, 0)),
                pl.BlockSpec((Cout, 9 * Cin), lambda n: (0, 0)),
                pl.BlockSpec((Cout, 1), lambda n: (0, 0)),
                pl.BlockSpec((1, HW), lambda n: (0, 0)),
            ],
            out_specs=pl.BlockSpec((1, Cout, HW), lambda n: (n, 0, 0)),
            scratch_shapes=[pltpu.VMEM((9 * Cin, HW), x_flat.dtype)],
        ),
        compiler_params=pltpu.CompilerParams(
            dimension_semantics=("parallel",),
            # Explicit scoped-VMEM budget (raise along with the tile size for
            # large frames; add an H-row tile axis with a 1-row halo on v7x).
            vmem_limit_bytes=32 * 1024 * 1024,
        ),
        cost_estimate=pl.CostEstimate(flops=flops, transcendentals=0,
                                      bytes_accessed=bytes_accessed),
    )(x_flat, w2, b2, col_ids)

    return out_flat.reshape(N, Cout, H, W)


if __name__ == "__main__":
    key = jax.random.PRNGKey(0)
    k_x, k_w, k_b = jax.random.split(key, 3)

    N, Cin, H, W = 2, 4, 16, 16
    Cout = 8

    x = jax.random.normal(k_x, (N, Cin, H, W), dtype=jnp.float32)
    # Deterministic synthetic parameter init (PyTorch-like uniform fan-in scale).
    fan_in = Cin * 3 * 3
    bound = 1.0 / (fan_in ** 0.5)
    weight = jax.random.uniform(k_w, (Cout, Cin, 3, 3),
                                minval=-bound, maxval=bound, dtype=jnp.float32)
    bias = jax.random.uniform(k_b, (Cout,),
                              minval=-bound, maxval=bound, dtype=jnp.float32)

    out = conv_block_forward(x, weight, bias)
    out = jax.block_until_ready(out)

    # Reference check with XLA conv (NCHW, OIHW) + bias + LeakyReLU(0.2).
    ref = lax.conv_general_dilated(
        x, weight, window_strides=(1, 1), padding=((1, 1), (1, 1)),
        dimension_numbers=("NCHW", "OIHW", "NCHW"))
    ref = ref + bias[None, :, None, None]
    ref = jnp.where(ref > 0, ref, 0.2 * ref)

    assert out.shape == (N, Cout, H, W)
    assert jnp.allclose(out, ref, rtol=1e-5, atol=1e-5)
    print("KERNEL_OK")
</pallas_src>

<mosaic_0001>
module attributes {stable_mosaic.version = 11 : i64} {
  func.func @conv_block_kernel(%arg0: i32, %arg1: memref<1x4x256xf32, #tpu.memory_space<vmem>>, %arg2: memref<8x36xf32, #tpu.memory_space<vmem>>, %arg3: memref<8x1xf32, #tpu.memory_space<vmem>>, %arg4: memref<1x256xi32, #tpu.memory_space<vmem>>, %arg5: memref<1x8x256xf32, #tpu.memory_space<vmem>>, %arg6: memref<36x256xf32, #tpu.memory_space<vmem>>) attributes {dimension_semantics = [#tpu.dimension_semantics<parallel>], iteration_bounds = array<i64: 2>, scalar_prefetch = 0 : i64, scratch_operands = 1 : i64, tpu.core_type = #tpu.core_type<tc>, window_params = [{transform_indices = @transform_0, window_bounds = array<i64: 1, 4, 256>}, {pipeline_mode = #tpu.pipeline_mode<synchronous>, transform_indices = @transform_1, window_bounds = array<i64: 8, 36>}, {pipeline_mode = #tpu.pipeline_mode<synchronous>, transform_indices = @transform_2, window_bounds = array<i64: 8, 1>}, {pipeline_mode = #tpu.pipeline_mode<synchronous>, transform_indices = @transform_3, window_bounds = array<i64: 1, 256>}, {transform_indices = @transform_4, window_bounds = array<i64: 1, 8, 256>}]} {
    %cst = arith.constant 0.000000e+00 : f32
    %0 = vector.broadcast %cst : f32 to vector<36x256xf32>
    %c0 = arith.constant 0 : index
    %c0_0 = arith.constant 0 : index
    %1 = vector.load %arg6[%c0, %c0_0] : memref<36x256xf32, #tpu.memory_space<vmem>>, vector<36x256xf32>
    tpu.vector_store %arg6[%c0, %c0_0], %0 {strides = array<i32>} : memref<36x256xf32, #tpu.memory_space<vmem>>, vector<36x256xf32>,
    %c0_1 = arith.constant 0 : index
    %c0_2 = arith.constant 0 : index
    %c0_3 = arith.constant 0 : index
    %2 = vector.load %arg1[%c0_1, %c0_2, %c0_3] : memref<1x4x256xf32, #tpu.memory_space<vmem>>, vector<1x4x256xf32>
    %3 = vector.shape_cast %2 : vector<1x4x256xf32> to vector<4x256xf32>
    %c0_4 = arith.constant 0 : index
    %c0_5 = arith.constant 0 : index
    %4 = vector.load %arg4[%c0_4, %c0_5] : memref<1x256xi32, #tpu.memory_space<vmem>>, vector<1x256xi32>
    %5 = vector.extract_strided_slice %3 {offsets = [0, 0], sizes = [4, 239], strides = [1, 1]} : vector<4x256xf32> to vector<4x239xf32>
    %6 = vector.extract_strided_slice %4 {offsets = [0, 17], sizes = [1, 239], strides = [1, 1]} : vector<1x256xi32> to vector<1x239xi32>
    %c1_i32 = arith.constant 1 : i32
    %7 = vector.broadcast %c1_i32 : i32 to vector<1x239xi32>
    %8 = arith.cmpi sge, %6, %7 : vector<1x239xi32>
    %cst_6 = arith.constant 0.000000e+00 : f32
    %9 = vector.shape_cast %8 : vector<1x239xi1> to vector<1x239xi1>
    %10 = vector.broadcast %9 : vector<1x239xi1> to vector<4x239xi1>
    %11 = vector.broadcast %cst_6 : f32 to vector<4x239xf32>
    %12 = arith.select %10, %5, %11 : vector<4x239xi1>, vector<4x239xf32>
    %c0_7 = arith.constant 0 : index
    %c17 = arith.constant 17 : index
    %13 = vector.load %arg6[%c0_7, %c17] : memref<36x256xf32, #tpu.memory_space<vmem>>, vector<4x239xf32>
    tpu.vector_store %arg6[%c0_7, %c17], %12 {strides = array<i32>} : memref<36x256xf32, #tpu.memory_space<vmem>>, vector<4x239xf32>,
    %14 = vector.extract_strided_slice %3 {offsets = [0, 0], sizes = [4, 240], strides = [1, 1]} : vector<4x256xf32> to vector<4x240xf32>
    %c4 = arith.constant 4 : index
    %c16 = arith.constant 16 : index
    %15 = vector.load %arg6[%c4, %c16] : memref<36x256xf32, #tpu.memory_space<vmem>>, vector<4x240xf32>
    tpu.vector_store %arg6[%c4, %c16], %14 {strides = array<i32>} : memref<36x256xf32, #tpu.memory_space<vmem>>, vector<4x240xf32>,
    %16 = vector.extract_strided_slice %3 {offsets = [0, 0], sizes = [4, 241], strides = [1, 1]} : vector<4x256xf32> to vector<4x241xf32>
    %17 = vector.extract_strided_slice %4 {offsets = [0, 15], sizes = [1, 241], strides = [1, 1]} : vector<1x256xi32> to vector<1x241xi32>
    %c14_i32 = arith.constant 14 : i32
    %18 = vector.broadcast %c14_i32 : i32 to vector<1x241xi32>
    %19 = arith.cmpi sle, %17, %18 : vector<1x241xi32>
    %cst_8 = arith.constant 0.000000e+00 : f32
    %20 = vector.shape_cast %19 : vector<1x241xi1> to vector<1x241xi1>
    %21 = vector.broadcast %20 : vector<1x241xi1> to vector<4x241xi1>
    %22 = vector.broadcast %cst_8 : f32 to vector<4x241xf32>
    %23 = arith.select %21, %16, %22 : vector<4x241xi1>, vector<4x241xf32>
    %c8 = arith.constant 8 : index
    %c15 = arith.constant 15 : index
    %24 = vector.load %arg6[%c8, %c15] : memref<36x256xf32, #tpu.memory_space<vmem>>, vector<4x241xf32>
    tpu.vector_store %arg6[%c8, %c15], %23 {strides = array<i32>} : memref<36x256xf32, #tpu.memory_space<vmem>>, vector<4x241xf32>,
    %25 = vector.extract_strided_slice %3 {offsets = [0, 0], sizes = [4, 255], strides = [1, 1]} : vector<4x256xf32> to vector<4x255xf32>
    %26 = vector.extract_strided_slice %4 {offsets = [0, 1], sizes = [1, 255], strides = [1, 1]} : vector<1x256xi32> to vector<1x255xi32>
    %c1_i32_9 = arith.constant 1 : i32
    %27 = vector.broadcast %c1_i32_9 : i32 to vector<1x255xi32>
    %28 = arith.cmpi sge, %26, %27 : vector<1x255xi32>
    %cst_10 = arith.constant 0.000000e+00 : f32
    %29 = vector.shape_cast %28 : vector<1x255xi1> to vector<1x255xi1>
    %30 = vector.broadcast %29 : vector<1x255xi1> to vector<4x255xi1>
    %31 = vector.broadcast %cst_10 : f32 to vector<4x255xf32>
    %32 = arith.select %30, %25, %31 : vector<4x255xi1>, vector<4x255xf32>
    %c12 = arith.constant 12 : index
    %c1 = arith.constant 1 : index
    %33 = vector.load %arg6[%c12, %c1] : memref<36x256xf32, #tpu.memory_space<vmem>>, vector<4x255xf32>
    tpu.vector_store %arg6[%c12, %c1], %32 {strides = array<i32>} : memref<36x256xf32, #tpu.memory_space<vmem>>, vector<4x255xf32>,
    %c16_11 = arith.constant 16 : index
    %c0_12 = arith.constant 0 : index
    %34 = vector.load %arg6[%c16_11, %c0_12] : memref<36x256xf32, #tpu.memory_space<vmem>>, vector<4x256xf32>
    tpu.vector_store %arg6[%c16_11, %c0_12], %3 {strides = array<i32>} : memref<36x256xf32, #tpu.memory_space<vmem>>, vector<4x256xf32>,
    %35 = vector.extract_strided_slice %3 {offsets = [0, 1], sizes = [4, 255], strides = [1, 1]} : vector<4x256xf32> to vector<4x255xf32>
    %36 = vector.extract_strided_slice %4 {offsets = [0, 0], sizes = [1, 255], strides = [1, 1]} : vector<1x256xi32> to vector<1x255xi32>
    %c14_i32_13 = arith.constant 14 : i32
    %37 = vector.broadcast %c14_i32_13 : i32 to vector<1x255xi32>
    %38 = arith.cmpi sle, %36, %37 : vector<1x255xi32>
    %cst_14 = arith.constant 0.000000e+00 : f32
    %39 = vector.shape_cast %38 : vector<1x255xi1> to vector<1x255xi1>
    %40 = vector.broadcast %39 : vector<1x255xi1> to vector<4x255xi1>
    %41 = vector.broadcast %cst_14 : f32 to vector<4x255xf32>
    %42 = arith.select %40, %35, %41 : vector<4x255xi1>, vector<4x255xf32>
    %c20 = arith.constant 20 : index
    %c0_15 = arith.constant 0 : index
    %43 = vector.load %arg6[%c20, %c0_15] : memref<36x256xf32, #tpu.memory_space<vmem>>, vector<4x255xf32>
    tpu.vector_store %arg6[%c20, %c0_15], %42 {strides = array<i32>} : memref<36x256xf32, #tpu.memory_space<vmem>>, vector<4x255xf32>,
    %44 = vector.extract_strided_slice %3 {offsets = [0, 15], sizes = [4, 241], strides = [1, 1]} : vector<4x256xf32> to vector<4x241xf32>
    %45 = vector.extract_strided_slice %4 {offsets = [0, 0], sizes = [1, 241], strides = [1, 1]} : vector<1x256xi32> to vector<1x241xi32>
    %c1_i32_16 = arith.constant 1 : i32
    %46 = vector.broadcast %c1_i32_16 : i32 to vector<1x241xi32>
    %47 = arith.cmpi sge, %45, %46 : vector<1x241xi32>
    %cst_17 = arith.constant 0.000000e+00 : f32
    %48 = vector.shape_cast %47 : vector<1x241xi1> to vector<1x241xi1>
    %49 = vector.broadcast %48 : vector<1x241xi1> to vector<4x241xi1>
    %50 = vector.broadcast %cst_17 : f32 to vector<4x241xf32>
    %51 = arith.select %49, %44, %50 : vector<4x241xi1>, vector<4x241xf32>
    %c24 = arith.constant 24 : index
    %c0_18 = arith.constant 0 : index
    %52 = vector.load %arg6[%c24, %c0_18] : memref<36x256xf32, #tpu.memory_space<vmem>>, vector<4x241xf32>
    tpu.vector_store %arg6[%c24, %c0_18], %51 {strides = array<i32>} : memref<36x256xf32, #tpu.memory_space<vmem>>, vector<4x241xf32>,
    %53 = vector.extract_strided_slice %3 {offsets = [0, 16], sizes = [4, 240], strides = [1, 1]} : vector<4x256xf32> to vector<4x240xf32>
    %c28 = arith.constant 28 : index
    %c0_19 = arith.constant 0 : index
    %54 = vector.load %arg6[%c28, %c0_19] : memref<36x256xf32, #tpu.memory_space<vmem>>, vector<4x240xf32>
    tpu.vector_store %arg6[%c28, %c0_19], %53 {strides = array<i32>} : memref<36x256xf32, #tpu.memory_space<vmem>>, vector<4x240xf32>,
    %55 = vector.extract_strided_slice %3 {offsets = [0, 17], sizes = [4, 239], strides = [1, 1]} : vector<4x256xf32> to vector<4x239xf32>
    %56 = vector.extract_strided_slice %4 {offsets = [0, 0], sizes = [1, 239], strides = [1, 1]} : vector<1x256xi32> to vector<1x239xi32>
    %c14_i32_20 = arith.constant 14 : i32
    %57 = vector.broadcast %c14_i32_20 : i32 to vector<1x239xi32>
    %58 = arith.cmpi sle, %56, %57 : vector<1x239xi32>
    %cst_21 = arith.constant 0.000000e+00 : f32
    %59 = vector.shape_cast %58 : vector<1x239xi1> to vector<1x239xi1>
    %60 = vector.broadcast %59 : vector<1x239xi1> to vector<4x239xi1>
    %61 = vector.broadcast %cst_21 : f32 to vector<4x239xf32>
    %62 = arith.select %60, %55, %61 : vector<4x239xi1>, vector<4x239xf32>
    %c32 = arith.constant 32 : index
    %c0_22 = arith.constant 0 : index
    %63 = vector.load %arg6[%c32, %c0_22] : memref<36x256xf32, #tpu.memory_space<vmem>>, vector<4x239xf32>
    tpu.vector_store %arg6[%c32, %c0_22], %62 {strides = array<i32>} : memref<36x256xf32, #tpu.memory_space<vmem>>, vector<4x239xf32>,
    %c0_23 = arith.constant 0 : index
    %c0_24 = arith.constant 0 : index
    %64 = vector.load %arg2[%c0_23, %c0_24] : memref<8x36xf32, #tpu.memory_space<vmem>>, vector<8x36xf32>
    %c0_25 = arith.constant 0 : index
    %c0_26 = arith.constant 0 : index
    %65 = vector.load %arg6[%c0_25, %c0_26] : memref<36x256xf32, #tpu.memory_space<vmem>>, vector<36x256xf32>
    %cst_27 = arith.constant dense<0.000000e+00> : vector<8x256xf32>
    %66 = tpu.matmul %64, %65, %cst_27 {dimension_numbers = #tpu.dot_dimension_numbers<[1], [0], [0], [1], [0, 0, 1, 1], [], []>} : vector<8x36xf32>, vector<36x256xf32>, vector<8x256xf32> -> vector<8x256xf32>
    %c0_28 = arith.constant 0 : index
    %c0_29 = arith.constant 0 : index
    %67 = vector.load %arg3[%c0_28, %c0_29] : memref<8x1xf32, #tpu.memory_space<vmem>>, vector<8x1xf32>
    %68 = vector.broadcast %67 : vector<8x1xf32> to vector<8x256xf32>
    %69 = arith.addf %66, %68 : vector<8x256xf32>
    %cst_30 = arith.constant 2.000000e-01 : f32
    %70 = vector.broadcast %cst_30 : f32 to vector<8x256xf32>
    %71 = arith.mulf %70, %69 : vector<8x256xf32>
    %72 = arith.maximumf %69, %71 : vector<8x256xf32>
    %c0_31 = arith.constant 0 : index
    %c0_32 = arith.constant 0 : index
    %c0_33 = arith.constant 0 : index
    %73 = vector.load %arg5[%c0_31, %c0_32, %c0_33] : memref<1x8x256xf32, #tpu.memory_space<vmem>>, vector<1x8x256xf32>
    %74 = vector.shape_cast %73 : vector<1x8x256xf32> to vector<8x256xf32>
    %75 = vector.shape_cast %72 : vector<8x256xf32> to vector<1x8x256xf32>
    tpu.vector_store %arg5[%c0_31, %c0_32, %c0_33], %75 {strides = array<i32>} : memref<1x8x256xf32, #tpu.memory_space<vmem>>, vector<1x8x256xf32>,
    return
  }
  func.func @transform_0(%arg0: i32) -> (i32, i32, i32) {
    %c0_i32 = arith.constant 0 : i32
    %c0_i32_0 = arith.constant 0 : i32
    %c0_i32_1 = arith.constant 0 : i32
    return %arg0, %c0_i32, %c0_i32_0 : i32, i32, i32
  }
  func.func @transform_1(%arg0: i32) -> (i32, i32) {
    %c0_i32 = arith.constant 0 : i32
    %c0_i32_0 = arith.constant 0 : i32
    %c0_i32_1 = arith.constant 0 : i32
    return %c0_i32, %c0_i32_0 : i32, i32
  }
  func.func @transform_2(%arg0: i32) -> (i32, i32) {
    %c0_i32 = arith.constant 0 : i32
    %c0_i32_0 = arith.constant 0 : i32
    %c0_i32_1 = arith.constant 0 : i32
    return %c0_i32, %c0_i32_0 : i32, i32
  }
  func.func @transform_3(%arg0: i32) -> (i32, i32) {
    %c0_i32 = arith.constant 0 : i32
    %c0_i32_0 = arith.constant 0 : i32
    %c0_i32_1 = arith.constant 0 : i32
    return %c0_i32, %c0_i32_0 : i32, i32
  }
  func.func @transform_4(%arg0: i32) -> (i32, i32, i32) {
    %c0_i32 = arith.constant 0 : i32
    %c0_i32_0 = arith.constant 0 : i32
    %c0_i32_1 = arith.constant 0 : i32
    return %arg0, %c0_i32, %c0_i32_0 : i32, i32, i32
  }
}

</mosaic_0001>

<bundles_post_ra>
// kernel: tpu_custom_call.1
= control target key start
LH: loop header
LB: loop body
LE: loop exit
PB: predicated region body
PF: predicated region fallthrough
CT: control target
= control target key end

     0   :  { %9 = vsyncpa [#allocation4], 0  ;;  %s980_s0 = inlined_call_operand.hbm [shape: f32[2,4,256], index: 0, kind: input, shape index: {}]   ;;  %s981_s1 = inlined_call_operand.vmem [shape: f32[8,36], index: 1, kind: input, shape index: {}]   ;;  %s982_s2 = inlined_call_operand.vmem [shape: f32[8,1], index: 2, kind: input, shape index: {}]   ;;  %s983_s3 = inlined_call_operand.vmem [shape: s32[1,256], index: 3, kind: input, shape index: {}]   ;;  %s984_s4 = inlined_call_operand.hbm [shape: f32[2,8,256], index: 4, kind: output, shape index: {}]  }
   0x1   :  { %11 = vsyncpa [#allocation4 + $0x1], 0 }
   0x2   :  { %12 = vsyncpa [#allocation5], 0 }
   0x3   :  { %14 = vsyncpa [#allocation5 + $0x1], 0  ;;  %s779_s15 = smov 0   ;;  %s781_s16 = smov 0  }
   0x4   :  { %s783_s17 = smov 0   ;;  %s785_s18 = smov 0  }
   0x5 LB: > { %s800_s19 = sadd.s32 4294967295, %s740_s18   ;;  %s558_s20 = sadd.s32 4294967294, %s740_s18   ;;  %s740_s18 = sphi %s785_s18, %s999_s18   ;;  %s736_s17 = sphi %s783_s17, %s998_s17   ;;  %s732_s16 = sphi %s781_s16, %s997_s16   ;;  %s728_s15 = sphi %s779_s15, %s996_s15  }
   0x6   : > { %s804_s21 = sadd.s32 1, %s740_s18   ;;  %s27_s22 = sadd.s32 1, %s736_s17 }
   0x7   : > { %s24_s23 = ssub.s32 %s740_s18, %s804_s21  ;;  %p34_p0 = scmp.ne.s32.totalorder %s736_s17, %s732_s16 }
   0x8   : > { %p25_p1 = scmp.eq.s32.totalorder %s24_s23, 0  ;;  %p35_p2 = scmp.eq.s32.totalorder %s740_s18, 0 }
   0x9   : > { %p40_p3 = scmp.ne.s32.totalorder %s732_s16, %s728_s15  ;;  %p41_p4 = scmp.eq.s32.totalorder %s800_s19, 0 }
   0xa   : > { %s816_s24 = scalar_select %p25_p1, %s736_s17, %s27_s22  }
   0xb   : > { %p818_p5 = por %p35_p2, %p34_p0  ;;  %p822_p6 = por %p41_p4, %p40_p3 }
   0xc   : > { %p127_p7 = scmp.eq.s32.totalorder %s800_s19, 1  ;;  %p133_p8 = scmp.eq.s32.totalorder %s558_s20, 1 }
   0xd   : > { %p597_p10 = scmp.lt.s32.totalorder %s740_s18, 2  ;;  %s162_s29 = sand.u32 1, %s736_s17  }
   0xe   : > { %p829_p11 = por %p127_p7, %p34_p0  ;;  %p833_p12 = por %p133_p8, %p40_p3 }
   0xf   : > { %s575_s30 = sshll.u32 %s740_s18, 7  ;;  %s561_s5 = sshll.u32 %s162_s29, 3 }
  0x10   : > { %s988_s27 = scalar_select %p829_p11, 1, 0 }
  0x11   : > { %s989_s28 = scalar_select %p833_p12, 1, 0 }
  0x12   : > { %s842_s8 = scalar_lea.hbm %s980_s0, %s575_s30  ;;  %s166_s9 = scalar_lea.vmem [#allocation3], %s561_s5 }
  0x13   : > { %s174_s10 = sshll.u32 %s166_s9, 4  ;;  %p846_p13 = pnand %p597_p10, %p818_p5  ;;  %s850_s10 = int_to_ptr.vmem [resolvable:$true] %s174_s10 }
  0x14   : > { %s163_s12 = scalar_lea.sflag [#allocation4], %s162_s29  ;;  %s644_s13 = scalar_lea.hbm %s842_s8, 128 }
  0x15   : > { %p645_p2 = scmp.ne.s32.totalorder %s842_s8, %s644_s13  ;;  %p646_p3 = pneg %p846_p13 }
  0x16   : > { %s649_s22 = scalar_lea.hbm %s980_s0, 256  ;;  %p650_p5 = scmp.lt.u32.totalorder %s842_s8, %s980_s0 }
  0x17   : > { %p647_p4 = pnand %p646_p3, %p645_p2  ;;  %p651_p8 = scmp.lt.u32.totalorder %s649_s22, %s644_s13 }
  0x18   : > { %p653_p9 = scmp.lt.u32.totalorder %s644_s13, %s842_s8 }
  0x19   : > { %p648_p7 = pneg %p647_p4  ;;  %p652_p10 = por %p651_p8, %p650_p5 }
  0x1b   : > { %p654_p0 = por %p653_p9, %p652_p10 }
  0x1d   : > { %p655_p1 = pnand %p654_p0, %p648_p7 }
  0x1f   : > { %658 = shalt.err (!%p655_p1)
}
  0x20   : > { %s659_s29 = scalar_lea.vmem %s850_s10, 128  ;;  %s742_s30 = smov [#allocation3]  }
  0x21   : > { %p660_p2 = scmp.ne.s32.totalorder %s850_s10, %s659_s29  ;;  %s664_s5 = sshll.u32 %s742_s30, 4  ;;  %s665_s5 = int_to_ptr.vmem [resolvable:$false] %s664_s5 }
  0x22   : > { %s666_s6 = scalar_lea.vmem %s665_s5, 256  ;;  %p667_p11 = scmp.lt.s32.totalorder %s850_s10, %s665_s5 }
  0x23   : > { %p662_p4 = pnand %p660_p2, %p646_p3  ;;  %p668_p5 = scmp.lt.s32.totalorder %s666_s6, %s659_s29 }
  0x25   : > { %p663_p12 = pneg %p662_p4  ;;  %p669_p8 = por %p668_p5, %p667_p11 }
  0x27   : > { %p670_p9 = pnand %p669_p8, %p663_p12 }
  0x29   : > { %673 = shalt.err (!%p670_p9)
}
  0x2a   : > { %592 = dma.hbm_to_vmem [thread:$0]  (!%p846_p13), %s842_s8, 128, %s850_s10, %s163_s12  }
  0x2b   : > { %p991_p0 = scmp.lt.s32.totalorder %s740_s18, 3  ;;  %p992_p1 = scmp.ge.s32.totalorder %s740_s18, 1 }
  0x2d   : > { %p180_p3 = pnand %p992_p1, %p991_p0 }
  0x2e   : > { %s884_s7 = sand.u32 (!%p180_p3), 1, %s732_s16  }
  0x2f   : > { %183 = sbr.rel (%p180_p3) target bundleno = 445 (0x1bd), region = 36  ;;  %s565_s9 = sshll.u32 (!%p180_p3), %s884_s7, 3 }
  0x30   : > { %s186_s13 = scalar_lea.sflag (!%p180_p3), [#allocation4], %s884_s7  ;;  %s189_s14 = scalar_lea.vmem (!%p180_p3), [#allocation3], %s565_s9 }
  0x36   : > { %719 = dma.done.wait (%p822_p6), %s186_s13, 128  }
  0x37   : > { %721 = vsyncadd (%p822_p6), %s186_s13, 4294967168  ;;  %v743_v0 = vmov 0.0   ;;  %v744_v1 = vmov 0   ;;  %v224_v2 = vld [vmem:[%s189_s14] sm:$0xff]  ;;  %s745_s8 = smov 17   ;;  %s746_s10 = smov 1   ;;  %v228_v6 = vlaneseq }
  0x38   : > { %214 = vst [vmem:[#allocation2] sm:$0xff] %v743_v0  ;;  %215 = vst [vmem:[#allocation2 + $0x8] sm:$0xff] %v743_v0  ;;  %460 = vmatprep.mubr.f32.mxu0 %v743_v0  ;;  %641 = vset.pattern.permute.xlu0 %v744_v1  ;;  %v239_v3 = vcombine.high %v224_v2, %v224_v2  ;;  %s747_s26 = smov 15   ;;  %v253_v4 = vcombine.low %v224_v2, %v224_v2  ;;  %s748_s11 = smov 16   ;;  %v379_v5 = vld [vmem:[%s982_s2] sm:$0xff]  ;;  %vm250_vm3 = vcmask 1043592  }
  0x39   : > { %216 = vst [vmem:[#allocation2 + $0x10] sm:$0xff] %v743_v0  ;;  %217 = vst [vmem:[#allocation2 + $0x18] sm:$0xff] %v743_v0  ;;  %240 = vrot.lane.b32.xlu1 %v224_v2, %s745_s8  ;;  %290 = vrot.lane.b32.xlu0 %v224_v2, %s746_s10  ;;  %s749_s12 = smov 127   ;;  %s750_s20 = smov 113   ;;  %v225_v7 = vld [vmem:[%s983_s3] sm:$0x3] }
  0x3a   : > { %218 = vst [vmem:[#allocation2 + $0x20] sm:$0xff] %v743_v0  ;;  %219 = vst [vmem:[#allocation2 + $0x28] sm:$0xff] %v743_v0  ;;  %s751_s22 = smov 112   ;;  %s752_s23 = smov 111   ;;  %v229_v8 = vshrl.u32 %v228_v6, 7  ;;  %vm226_vm0 = vcmp.ge.s32.totalorder %v225_v7, 1 }
  0x3b   : > { %220 = vst [vmem:[#allocation2 + $0x30] sm:$0xff] %v743_v0  ;;  %221 = vst [vmem:[#allocation2 + $0x38] sm:$0xff] %v743_v0  ;;  %v227_v10 = vsel %vm226_vm0, 1, %v744_v1  ;;  %vm265_vm1 = vcmp.le.s32.totalorder %v225_v7, 14  ;;  %vm306_vm4 = vcmask 1047564   ;;  %vm244_vm6 = vcmask 138240  }
  0x3c   : > { %222 = vst [vmem:[#allocation2 + $0x40] sm:$0xf] %v743_v0  ;;  %223 = vst [vmem:[#allocation2 + $0x48] sm:$0xf] %v743_v0  ;;  %v230_v9 = vsub.s32 0, %v229_v8  ;;  %v266_v12 = vsel %vm265_vm1, 1, %v744_v1 }
  0x3d   : > { %310 = vst [vmem:[#allocation2 + $0x20] sm:$0xf] %v224_v2  ;;  %311 = vst [vmem:[#allocation2 + $0x28] sm:$0xf] %v239_v3  ;;  %277 = vrot.lane.b32.xlu0 %v224_v2, %s747_s26  ;;  %242 = vrot.lane.b32.xlu1 %v239_v3, %s745_s8  ;;  %v234_v13 = vsub.s32 1, %v229_v8  ;;  %vm287_vm7 = vcmask 1043576  }
  0x3e   : > { %v898_v11 = vrot.slane %v227_v10, %v230_v9  ;;  %v901_v14 = vrot.slane %v266_v12, %v230_v9  ;;  %vm281_vm9 = vcmask 121856   ;;  %vm294_vm10 = vcmask 7168   ;;  %v368_v7 = vld [vmem:[%s981_s1] sm:$0xff]  ;;  %s566_s13 = sshll.u32 %s884_s7, 4  ;;  %s576_s14 = sshll.u32 %s800_s19, 8 }
  0x3f   : > { %v235_v15 = vrot.slane %v227_v10, %v234_v13  ;;  %v908_v21 = vrot.slane %v266_v12, %v234_v13  ;;  %vm258_vm12 = vcmask 130048   ;;  %vm262_vm13 = vcmask 1047684   ;;  %s213_s8 = scalar_lea.vmem [#allocation6], %s566_s13  ;;  %p993_p11 = scmp.ne.s32.totalorder %s988_s27, 0 }
  0x40   : > { %vm236_vm2 = vcmp.eq.s32.totalorder %v898_v11, 1  ;;  %vm275_vm5 = vcmp.eq.s32.totalorder %v901_v14, 1  ;;  %vm316_vm14 = vcmask 1039360   ;;  %vm329_vm15 = vcmask 1039364   ;;  %s753_s19 = smov [#allocation6]  }
  0x41   : > { %279 = vrot.lane.b32.xlu1 %v239_v3, %s747_s26  ;;  %292 = vrot.lane.b32.xlu0 %v239_v3, %s746_s10  ;;  %vm237_vm8 = vcmp.eq.s32.totalorder %v235_v15, 1  ;;  %vm276_vm11 = vcmp.eq.s32.totalorder %v908_v21, 1  ;;  %vm335_vm0 = vcmask 924672   ;;  %vm342_vm1 = vcmask 920576   ;;  %s488_s10 = sshll.u32 %s213_s8, 4  ;;  %s938_s10 = int_to_ptr.vmem [resolvable:$true] %s488_s10 }
  0x45   : > { %256 = vrot.lane.b32.xlu1 %v224_v2, %s748_s11  ;;  %254 = vrot.lane.b32.xlu0 %v253_v4, %s748_s11 }
  0x49   : > { %314 = vrot.lane.b32.xlu1 %v239_v3, %s749_s12  ;;  %312 = vrot.lane.b32.xlu0 %v224_v2, %s749_s12  ;;  %s936_s12 = scalar_lea.hbm %s984_s4, %s576_s14 }
  0x4d   : > { %333 = vrot.lane.b32.xlu1 %v239_v3, %s750_s20  ;;  %331 = vrot.lane.b32.xlu0 %v224_v2, %s750_s20  ;;  %s474_s20 = scalar_lea.sflag [#allocation5], %s884_s7 }
  0x51   : > { %346 = vrot.lane.b32.xlu1 %v224_v2, %s751_s22  ;;  %344 = vrot.lane.b32.xlu0 %v253_v4, %s751_s22  ;;  %s674_s22 = scalar_lea.vmem %s938_s10, 256 }
  0x52   : > { %p675_p6 = scmp.ne.s32.totalorder %s938_s10, %s674_s22 }
  0x54   : > { %p676_p12 = pnand %p675_p6, %p993_p11 }
  0x55   : > { %357 = vrot.lane.b32.xlu1 %v239_v3, %s752_s23  ;;  %355 = vrot.lane.b32.xlu0 %v224_v2, %s752_s23  ;;  %s678_s23 = sshll.u32 %s753_s19, 4  ;;  %s679_s23 = int_to_ptr.vmem [resolvable:$false] %s678_s23 }
  0x56   : > { %p677_p13 = pneg %p676_p12  ;;  %s680_s25 = scalar_lea.vmem %s679_s23, 512 }
  0x57   : > { %p681_p7 = scmp.lt.s32.totalorder %s938_s10, %s679_s23  ;;  %p682_p10 = scmp.lt.s32.totalorder %s680_s25, %s674_s22 }
  0x59   : > { %382 = vperm.xlu0 %641, %v379_v5   ;;  %p683_p2 = por %p682_p10, %p681_p7 }
  0x5b   : > { %p684_p4 = pnand %p683_p2, %p677_p13 }
  0xab   : > { %v241_v16 = vpop.permute.xlu1 %240  ;;  %v291_v17 = vpop.permute.xlu0 %290 }
  0xac   : > { %v248_v18 = vsel %vm236_vm2, %v241_v16, 0.0  ;;  %v298_v19 = vsel %vm236_vm2, %v291_v17, 0.0 }
  0xad   : > { %251 = vst.msk [vmem:[#allocation2] sm:$0xf] %vm250_vm3, %v248_v18  ;;  %v302_v20 = vrot.slane %v298_v19, 4  ;;  %vm353_vm3 = vcmask 916484  }
  0xaf   : > { %v278_v22 = vpop.permute.xlu0 %277  ;;  %307 = vst.msk [vmem:[#allocation2 + $0x10] sm:$0xf0] %vm306_vm4, %v302_v20  ;;  %v243_v23 = vpop.permute.xlu1 %242  ;;  %vm348_vm4 = vcmask 916480  }
  0xb0   : > { %v285_v24 = vsel %vm275_vm5, %v278_v22, 0.0  ;;  %v245_v25 = vsel %vm244_vm6, %v241_v16, %v243_v23  ;;  %vm359_vm6 = vcmask 908288  }
  0xb1   : > { %288 = vst.msk [vmem:[#allocation2 + $0x10] sm:$0xf] %vm287_vm7, %v285_v24  ;;  %v249_v26 = vsel %vm237_vm8, %v245_v25, 0.0  ;;  %vm366_vm7 = vcmask 904192  }
  0xb2   : > { %252 = vst [vmem:[#allocation2 + $0x8] sm:$0xf] %v249_v26 }
  0xb3   : > { %v280_v27 = vpop.permute.xlu1 %279  ;;  %v293_v28 = vpop.permute.xlu0 %292 }
  0xb4   : > { %v282_v29 = vsel %vm281_vm9, %v278_v22, %v280_v27  ;;  %v295_v30 = vsel %vm294_vm10, %v291_v17, %v293_v28 }
  0xb5   : > { %v286_v31 = vsel %vm276_vm11, %v282_v29, 0.0  ;;  %v299_v32 = vsel %vm237_vm8, %v295_v30, 0.0 }
  0xb6   : > { %289 = vst [vmem:[#allocation2 + $0x18] sm:$0xf] %v286_v31  ;;  %v303_v33 = vrot.slane %v299_v32, 4 }
  0xb7   : > { %v257_v34 = vpop.permute.xlu1 %256  ;;  %v255_v35 = vpop.permute.xlu0 %254 }
  0xb8   : > { %308 = vst [vmem:[#allocation2 + $0x18] sm:$0xf0] %v303_v33  ;;  %v259_v36 = vsel %vm258_vm12, %v255_v35, %v257_v34  ;;  %263 = vst.msk [vmem:[#allocation2] sm:$0xf0] %vm262_vm13, %v255_v35  ;;  %v371_v53 = vld [vmem:[#allocation2 + $0x10] sm:$0xff] }
  0xb9   : > { %264 = vst [vmem:[#allocation2 + $0x8] sm:$0xf0] %v259_v36 }
  0xbb   : > { %v315_v37 = vpop.permute.xlu1 %314  ;;  %v313_v38 = vpop.permute.xlu0 %312 }
  0xbc   : > { %v321_v39 = vsel %vm276_vm11, %v315_v37, 0.0  ;;  %v317_v40 = vsel %vm316_vm14, %v313_v38, %v315_v37 }
  0xbd   : > { %v325_v41 = vrot.slane %v321_v39, 4  ;;  %v320_v42 = vsel %vm275_vm5, %v317_v40, 0.0 }
  0xbe   : > { %v324_v43 = vrot.slane %v320_v42, 4 }
  0xbf   : > { %330 = vst.msk [vmem:[#allocation2 + $0x28] sm:$0xf0] %vm329_vm15, %v325_v41  ;;  %v334_v44 = vpop.permute.xlu1 %333  ;;  %v332_v45 = vpop.permute.xlu0 %331  ;;  %v372_v46 = vld [vmem:[#allocation2 + $0x18] sm:$0xff]  ;;  %v369_v47 = vld [vmem:[#allocation2] sm:$0xff] }
  0xc0   : > { %328 = vst [vmem:[#allocation2 + $0x20] sm:$0xf0] %v324_v43  ;;  %v340_v48 = vsel %vm237_vm8, %v334_v44, 0.0  ;;  %v336_v49 = vsel %vm335_vm0, %v332_v45, %v334_v44  ;;  %v370_v50 = vld [vmem:[#allocation2 + $0x8] sm:$0xff]  ;;  %v579_v54 = vpack.c.bf16 %v371_v53, %v369_v47 }
  0xc1   : > { %343 = vst.msk [vmem:[#allocation2 + $0x38] sm:$0xf] %vm342_vm1, %v340_v48  ;;  %v339_v51 = vsel %vm236_vm2, %v336_v49, 0.0  ;;  %v577_v52 = vpack.c.bf16 %v372_v46, %v370_v50  ;;  %vm389_vm2 = vcmask 1043456  }
  0xc2   : > { %341 = vst [vmem:[#allocation2 + $0x30] sm:$0xf] %v339_v51 }
  0xc3   : > { %v347_v55 = vpop.permute.xlu1 %346  ;;  %v345_v56 = vpop.permute.xlu0 %344  ;;  %578 = vmatprep.subr.bf16.mxu0 %v577_v52 }
  0xc4   : > { %354 = vst.msk [vmem:[#allocation2 + $0x38] sm:$0xf0] %vm353_vm3, %v347_v55  ;;  %v349_v57 = vsel %vm348_vm4, %v345_v56, %v347_v55  ;;  %580 = vmatpush1.bf16.msra.mxu0 %v579_v54 }
  0xc5   : > { %352 = vst [vmem:[#allocation2 + $0x30] sm:$0xf0] %v349_v57 }
  0xc6   : > { %v374_v63 = vld [vmem:[#allocation2 + $0x28] sm:$0xff] }
  0xc7   : > { %v358_v58 = vpop.permute.xlu1 %357  ;;  %v356_v59 = vpop.permute.xlu0 %355  ;;  %v373_v2 = vld [vmem:[#allocation2 + $0x20] sm:$0xff] }
  0xc8   : > { %v364_v60 = vsel %vm276_vm11, %v358_v58, 0.0  ;;  %v360_v61 = vsel %vm359_vm6, %v356_v59, %v358_v58 }
  0xc9   : > { %367 = vst.msk [vmem:[#allocation2 + $0x48] sm:$0xf] %vm366_vm7, %v364_v60  ;;  %v363_v62 = vsel %vm275_vm5, %v360_v61, 0.0  ;;  %vm385_vm5 = vcmask 293888  }
  0xca   : > { %365 = vst [vmem:[#allocation2 + $0x40] sm:$0xf] %v363_v62 }
  0xcb   : > { %v376_v0 = vld [vmem:[#allocation2 + $0x38] sm:$0xff] }
  0xcc   : > { %v581_v1 = vpack.c.bf16 %v376_v0, %v374_v63  ;;  %v375_v3 = vld [vmem:[#allocation2 + $0x30] sm:$0xff] }
  0xcd   : > { %v583_v4 = vpack.c.bf16 %v375_v3, %v373_v2 }
  0xce   : > { %582 = vmatprep.subr.bf16.mxu0 %v581_v1 }
  0xcf   : > { %584 = vmatpush1.bf16.msra.mxu0 %v583_v4 }
  0xd0   : > { %v378_v5 = vld [vmem:[#allocation2 + $0x48] sm:$0xf] }
  0xd1   : > { %567 = vmatprep.subr.msk.mxu0 %vm389_vm2, %v378_v5  ;;  %v377_v6 = vld [vmem:[#allocation2 + $0x40] sm:$0xf] }
  0xd3   : > { %568 = vmatpush1.msk.msra.mxu0 %vm389_vm2, %v377_v6 }
  0xd4   : > { %569 = vmatmul.mubr.msk.f32.vlgmr.msra.gmra.mrb[0].mxu0 %vm385_vm5, %v368_v7 }
  0xd8   : > { %v383_v8 = vpop.permute.xlu0 %382 }
 0x1a7   : > { %v462_v9 = vpop.f32.mrb[0].mxu0 }
 0x1a8   : > { %v463_v10 = vadd.f32 %v462_v9, %v383_v8  ;;  %v464_v11 = vpop.f32.mrb[1].mxu0 }
 0x1a9   : > { %v465_v12 = vadd.f32 %v464_v11, %v383_v8 }
 0x1aa   : > { %v467_v13 = vmul.f32 0.2, %v463_v10 }
 0x1ab   : > { %v468_v14 = vmul.f32 0.2, %v465_v12 }
 0x1ac   : > { %v469_v15 = vmax.f32 %v463_v10, %v467_v13 }
 0x1ad   : > { %v470_v16 = vmax.f32 %v465_v12, %v468_v14 }
 0x1ae   : > { %471 = vst [vmem:[%s213_s8] sm:$0xff] %v469_v15 }
 0x1af   : > { %472 = vst [vmem:[%s213_s8 + $0x8] sm:$0xff] %v470_v16 }
 0x1b0   : > { %687 = shalt.err (!%p684_p4)
}
 0x1b1   : > { %s688_s7 = scalar_lea.hbm %s936_s12, 256  ;;  %s692_s5 = scalar_lea.hbm %s984_s4, 512 }
 0x1b2   : > { %p689_p5 = scmp.ne.s32.totalorder %s936_s12, %s688_s7  ;;  %p693_p0 = scmp.lt.u32.totalorder %s936_s12, %s984_s4 }
 0x1b3   : > { %p694_p1 = scmp.lt.u32.totalorder %s692_s5, %s688_s7  ;;  %p696_p6 = scmp.lt.u32.totalorder %s688_s7, %s936_s12 }
 0x1b4   : > { %p690_p8 = pnand %p689_p5, %p993_p11 }
 0x1b5   : > { %p695_p3 = por %p694_p1, %p693_p0 }
 0x1b6   : > { %p691_p9 = pneg %p690_p8 }
 0x1b7   : > { %p697_p12 = por %p696_p6, %p695_p3 }
 0x1b9   : > { %p698_p13 = pnand %p697_p12, %p691_p9 }
 0x1bb   : > { %701 = shalt.err (!%p698_p13)
}
 0x1bc   : > { %587 = dma.vmem_to_hbm [thread:$0]  (%p993_p11), %s938_s10, 256, %s936_s12, %s474_s20  }
 0x1bd PF: > { %s500_s13 = sand.u32 1, %s728_s15   ;;  %p994_p7 = scmp.ne.s32.totalorder %s989_s28, 0 }
 0x1be   : > { %p995_p10 = scmp.ge.s32.totalorder %s740_s18, 2  ;;  %s501_s14 = scalar_lea.sflag [#allocation5], %s500_s13 }
 0x1c0   : > { %p594_p2 = pnand %p995_p10, %p994_p7 }
 0x1c2   : > { %723 = dma.done.wait (!%p594_p2), %s501_s14, 256  }
 0x1c3   : > { %725 = vsyncadd (!%p594_p2), %s501_s14, 4294967040  ;;  %p17_p4 = scmp.ge.s32.totalorder %s804_s21, 4   ;;  %s996_s15 = smov %s732_s16 }
 0x1c4   : > { %s997_s16 = smov %s736_s17  ;;  %s998_s17 = smov %s816_s24 }
 0x1c5   : > { %s999_s18 = smov %s804_s21  ;;  %19 = sbr.rel (!%p17_p4) target bundleno = 5 (0x5), region = 81 }
 0x1cc   :  { %506 = vsyncpa [#allocation4], 1 }
 0x1cd   :  { %508 = vsyncpa [#allocation4 + $0x1], 1 }
 0x1ce   :  { %509 = vsyncpa [#allocation5], 1 }
 0x1cf   :  { %511 = vsyncpa [#allocation5 + $0x1], 1 }

</bundles_post_ra>
